<compile_context>
chip_gen: v6e
topology: v6e:2x2x1
jax: 0.10.0
libtpu: 0.0.40
codegen_flags: <defaults>
</compile_context>

<pallas_src>
import jax
import jax.numpy as jnp
from jax.experimental import pallas as pl
from jax.experimental.pallas import tpu as pltpu


def _round_up(n, m):
    return ((n + m - 1) // m) * m


def _make_partial_kernel(rows, tile_rows, need_row_mask):
    """Per-tile sum of |log(y) - log(x)|, reduced to an (8, cols) block."""

    def kernel(x_ref, y_ref, out_ref):
        x = x_ref[...].astype(jnp.float32)
        y = y_ref[...].astype(jnp.float32)
        if need_row_mask:
            row_ids = (pl.program_id(0) * tile_rows
                       + jax.lax.broadcasted_iota(jnp.int32, x.shape, 0))
            valid = row_ids < rows
            # Replace out-of-range rows with 1.0 BEFORE log: log(1) = 0.
            x = jnp.where(valid, x, jnp.float32(1.0))
            y = jnp.where(valid, y, jnp.float32(1.0))
        d = jnp.abs(jnp.log(y) - jnp.log(x))          # (tile_rows, cols) f32
        cols = d.shape[-1]
        # Sublane-tile-aligned fold: (T, C) -> (T//8, 8, C) is layout-free and
        # the sum over axis 0 is plain VPU adds (no extra VMEM accumulator,
        # no competing vld/vst traffic).
        out_ref[...] = jnp.sum(d.reshape(tile_rows // 8, 8, cols), axis=0)

    return kernel


def log_stft_magnitude_loss(x_mag, y_mag, *, tile_rows=1024):
    """Pallas equivalent of LogSTFTMagnitudeLoss.forward(x_mag, y_mag)."""
    assert x_mag.shape == y_mag.shape, "x_mag / y_mag must have the same shape"
    b, frames, freq = x_mag.shape
    n_elems = b * frames * freq

    rows, cols = b * frames, freq
    x2 = x_mag.reshape(rows, cols)
    y2 = y_mag.reshape(rows, cols)

    itemsize = jnp.dtype(x2.dtype).itemsize
    row_align = 16 if itemsize == 2 else 8     # bf16 needs (16,128) min tiles

    # Clamp the tile to the array extent, and to a VMEM budget that keeps the
    # double-buffered inputs (2 inputs x 2 buffers) under ~16 MiB so the same
    # tiling is safe on v7x (64 MiB physical VMEM) as well as v5e/v6e.
    tile_rows = min(tile_rows, _round_up(rows, row_align))
    tile_rows = max(row_align, _round_up(tile_rows, row_align))
    max_in_buf_bytes = 16 << 20
    while (tile_rows > row_align
           and 4 * tile_rows * cols * itemsize > max_in_buf_bytes):
        tile_rows = max(row_align, _round_up(tile_rows // 2, row_align))

    num_blocks = pl.cdiv(rows, tile_rows)
    need_row_mask = (rows % tile_rows) != 0

    in_buf_bytes = 4 * tile_rows * cols * itemsize     # 2 inputs x 2 buffers
    tmp_bytes = 4 * tile_rows * cols * 4               # generous f32 temps
    vmem_limit_bytes = int(
        min(48 << 20, max(16 << 20, in_buf_bytes + tmp_bytes + (2 << 20))))

    kernel = _make_partial_kernel(rows, tile_rows, need_row_mask)

    cost = pl.CostEstimate(
        flops=3 * n_elems,
        transcendentals=2 * n_elems,
        bytes_accessed=2 * n_elems * itemsize + num_blocks * 8 * cols * 4,
    )

    partials = pl.pallas_call(
        kernel,
        out_shape=jax.ShapeDtypeStruct((num_blocks, 8, cols), jnp.float32),
        grid=(num_blocks,),
        in_specs=[
            pl.BlockSpec((tile_rows, cols), lambda i: (i, 0)),
            pl.BlockSpec((tile_rows, cols), lambda i: (i, 0)),
        ],
        # Each grid step owns its own lane-dense output block -> parallel grid.
        out_specs=pl.BlockSpec((None, 8, cols), lambda i: (i, 0, 0)),
        compiler_params=pltpu.CompilerParams(
            dimension_semantics=("parallel",),
            vmem_limit_bytes=vmem_limit_bytes,
        ),
        cost_estimate=cost,
    )(x2, y2)

    # Tiny final reduction + mean over the true (unmasked) element count.
    # NOTE: log(0) = -inf / log(<0) = NaN propagate into the mean, exactly as
    # in the PyTorch reference.
    return jnp.sum(partials) / jnp.float32(n_elems)


if __name__ == "__main__":
    key = jax.random.PRNGKey(0)
    kx, ky = jax.random.split(key)

    # (B, #frames, #freq_bins) -- magnitudes strictly positive for log().
    B, FRAMES, FREQ = 2, 8, 16
    x_mag = jax.random.uniform(kx, (B, FRAMES, FREQ), jnp.float32, 0.1, 2.0)
    y_mag = jax.random.uniform(ky, (B, FRAMES, FREQ), jnp.float32, 0.1, 2.0)

    loss = jax.block_until_ready(log_stft_magnitude_loss(x_mag, y_mag))
    ref = jnp.mean(jnp.abs(jnp.log(y_mag) - jnp.log(x_mag)))
    assert jnp.allclose(loss, ref, rtol=1e-5, atol=1e-6), (loss, ref)

    # Ragged shape exercising the in-kernel row mask (no jnp.pad HBM copy).
    kx2, ky2 = jax.random.split(ky)
    B2, FRAMES2, FREQ2 = 2, 37, 33
    x2 = jax.random.uniform(kx2, (B2, FRAMES2, FREQ2), jnp.float32, 0.1, 2.0)
    y2 = jax.random.uniform(ky2, (B2, FRAMES2, FREQ2), jnp.float32, 0.1, 2.0)
    loss2 = jax.block_until_ready(log_stft_magnitude_loss(x2, y2, tile_rows=32))
    ref2 = jnp.mean(jnp.abs(jnp.log(y2) - jnp.log(x2)))
    assert jnp.allclose(loss2, ref2, rtol=1e-5, atol=1e-6), (loss2, ref2)

    print("KERNEL_OK")
</pallas_src>

<mosaic_0001>
module attributes {stable_mosaic.version = 11 : i64} {
  func.func @kernel(%arg0: i32, %arg1: memref<16x16xf32, #tpu.memory_space<vmem>>, %arg2: memref<16x16xf32, #tpu.memory_space<vmem>>, %arg3: memref<1x8x16xf32, #tpu.memory_space<vmem>>) attributes {dimension_semantics = [#tpu.dimension_semantics<parallel>], iteration_bounds = array<i64: 1>, scalar_prefetch = 0 : i64, scratch_operands = 0 : i64, tpu.core_type = #tpu.core_type<tc>, window_params = [{transform_indices = @transform_0, window_bounds = array<i64: 16, 16>}, {transform_indices = @transform_1, window_bounds = array<i64: 16, 16>}, {transform_indices = @transform_2, window_bounds = array<i64: 1, 8, 16>}]} {
    %c0 = arith.constant 0 : index
    %c0_0 = arith.constant 0 : index
    %0 = vector.load %arg1[%c0, %c0_0] : memref<16x16xf32, #tpu.memory_space<vmem>>, vector<16x16xf32>
    %c0_1 = arith.constant 0 : index
    %c0_2 = arith.constant 0 : index
    %1 = vector.load %arg2[%c0_1, %c0_2] : memref<16x16xf32, #tpu.memory_space<vmem>>, vector<16x16xf32>
    %2 = math.log %1 : vector<16x16xf32>
    %3 = math.log %0 : vector<16x16xf32>
    %4 = arith.subf %2, %3 : vector<16x16xf32>
    %5 = math.absf %4 : vector<16x16xf32>
    %6 = vector.shape_cast %5 : vector<16x16xf32> to vector<2x8x16xf32>
    %cst = arith.constant dense<0.000000e+00> : vector<8x16xf32>
    %7 = vector.multi_reduction <add>, %6, %cst [0] : vector<2x8x16xf32> to vector<8x16xf32>
    %c0_3 = arith.constant 0 : index
    %c0_4 = arith.constant 0 : index
    %c0_5 = arith.constant 0 : index
    %8 = vector.load %arg3[%c0_3, %c0_4, %c0_5] : memref<1x8x16xf32, #tpu.memory_space<vmem>>, vector<1x8x16xf32>
    %9 = vector.shape_cast %8 : vector<1x8x16xf32> to vector<8x16xf32>
    %10 = vector.shape_cast %7 : vector<8x16xf32> to vector<1x8x16xf32>
    tpu.vector_store %arg3[%c0_3, %c0_4, %c0_5], %10 {strides = array<i32>} : memref<1x8x16xf32, #tpu.memory_space<vmem>>, vector<1x8x16xf32>,
    return
  }
  func.func @transform_0(%arg0: i32) -> (i32, i32) {
    %c0_i32 = arith.constant 0 : i32
    %c0_i32_0 = arith.constant 0 : i32
    return %arg0, %c0_i32 : i32, i32
  }
  func.func @transform_1(%arg0: i32) -> (i32, i32) {
    %c0_i32 = arith.constant 0 : i32
    %c0_i32_0 = arith.constant 0 : i32
    return %arg0, %c0_i32 : i32, i32
  }
  func.func @transform_2(%arg0: i32) -> (i32, i32, i32) {
    %c0_i32 = arith.constant 0 : i32
    %c0_i32_0 = arith.constant 0 : i32
    %c0_i32_1 = arith.constant 0 : i32
    return %arg0, %c0_i32, %c0_i32_0 : i32, i32, i32
  }
}

</mosaic_0001>

<bundles_post_ra>
// kernel: tpu_custom_call.1
= control target key start
LH: loop header
LB: loop body
LE: loop exit
PB: predicated region body
PF: predicated region fallthrough
CT: control target
= control target key end

     0   :  { %7 = vsyncpa [#allocation3], 0  ;;  %s185_s0 = inlined_call_operand.hbm [shape: f32[16,16], index: 0, kind: input, shape index: {}]   ;;  %s186_s1 = inlined_call_operand.hbm [shape: f32[16,16], index: 1, kind: input, shape index: {}]   ;;  %s187_s2 = inlined_call_operand.hbm [shape: f32[1,8,16], index: 2, kind: output, shape index: {}]  }
   0x1   :  { %8 = vsyncpa [#allocation6], 0 }
   0x2   :  { %9 = vsyncpa [#allocation4], 0  ;;  %s156_s9 = smov [#allocation2]  }
   0x3   :  { %s15_s10 = sshll.u32 %s156_s9, 4  ;;  %s16_s10 = int_to_ptr.vmem [resolvable:$true] %s15_s10 }
   0x4   :  { %s98_s11 = scalar_lea.vmem %s16_s10, 256  ;;  %p103_p1 = scmp.lt.s32.totalorder %s16_s10, %s16_s10 }
   0x5   :  { %p99_p0 = scmp.ne.s32.totalorder %s16_s10, %s98_s11  ;;  %p104_p2 = scmp.lt.s32.totalorder %s98_s11, %s98_s11 }
   0x7   :  { %p105_p3 = por %p104_p2, %p103_p1 }
   0x9   :  { %p106_p4 = pnand %p105_p3, %p99_p0 }
   0xb   :  { %109 = shalt.err (!%p106_p4)
}
   0xc   :  { %s157_s12 = smov 128   ;;  %s158_s13 = smov 8  }
   0xd   :  { %21 = dma.hbm_to_vmem [thread:$0]  %s185_s0, 256, %s16_s10, [#allocation3], %s157_s12, %s157_s12, %s158_s13  }
   0xe   :  { %s159_s16 = smov [#allocation5]  }
   0xf   :  { %s27_s17 = sshll.u32 %s159_s16, 4  ;;  %s28_s17 = int_to_ptr.vmem [resolvable:$true] %s27_s17 }
  0x10   :  { %s118_s18 = scalar_lea.vmem %s28_s17, 256  ;;  %p123_p6 = scmp.lt.s32.totalorder %s28_s17, %s28_s17 }
  0x11   :  { %p119_p5 = scmp.ne.s32.totalorder %s28_s17, %s118_s18  ;;  %p124_p7 = scmp.lt.s32.totalorder %s118_s18, %s118_s18 }
  0x13   :  { %p125_p8 = por %p124_p7, %p123_p6 }
  0x15   :  { %p126_p9 = pnand %p125_p8, %p119_p5 }
  0x17   :  { %129 = shalt.err (!%p126_p9)
}
  0x18   :  { %33 = dma.hbm_to_vmem [thread:$0]  %s186_s1, 256, %s28_s17, [#allocation6], %s157_s12, %s157_s12, %s158_s13  }
  0x19   :  { %150 = dma.done.wait [#allocation3], 256  }
  0x1a   :  { %151 = vsyncadd [#allocation3], 4294967040 }
  0x1b   :  { %152 = dma.done.wait [#allocation6], 256  }
  0x1c   :  { %153 = vsyncadd [#allocation6], 4294967040  ;;  %v40_v0 = vld [vmem:[#allocation2] sm:$0xff]  ;;  %v42_v1 = vld [vmem:[#allocation5] sm:$0xff]  ;;  %vm56_vm0 = vcmask 130048   ;;  %s160_s0 = smov [#allocation7]  }
  0x1d   :  { %v41_v2 = vld [vmem:[#allocation2 + $0x8] sm:$0xff]  ;;  %v43_v3 = vld [vmem:[#allocation5 + $0x8] sm:$0xff]  ;;  %82 = vlog2.f32 %v42_v1  ;;  %s67_s1 = sshll.u32 %s160_s0, 4  ;;  %s68_s1 = int_to_ptr.vmem [resolvable:$true] %s67_s1 }
  0x1e   :  { %84 = vlog2.f32 %v43_v3  ;;  %s130_s21 = scalar_lea.vmem %s68_s1, 128  ;;  %p135_p11 = scmp.lt.s32.totalorder %s68_s1, %s68_s1 }
  0x1f   :  { %86 = vlog2.f32 %v40_v0  ;;  %p131_p10 = scmp.ne.s32.totalorder %s68_s1, %s130_s21  ;;  %p136_p12 = scmp.lt.s32.totalorder %s130_s21, %s130_s21 }
  0x20   :  { %88 = vlog2.f32 %v41_v2 }
  0x21   :  { %p137_p13 = por %p136_p12, %p135_p11 }
  0x23   :  { %p138_p0 = pnand %p137_p13, %p131_p10 }
  0x2a   :  { %v83_v4 = vpop.eup %82 }
  0x2b   :  { %v85_v5 = vpop.eup %84  ;;  %v45_v6 = vmul.f32 0.6931472, %v83_v4 }
  0x2c   :  { %v87_v7 = vpop.eup %86  ;;  %v47_v8 = vmul.f32 0.6931472, %v85_v5 }
  0x2d   :  { %v89_v9 = vpop.eup %88  ;;  %v49_v10 = vmul.f32 0.6931472, %v87_v7 }
  0x2e   :  { %v51_v11 = vmul.f32 0.6931472, %v89_v9 }
  0x2f   :  { %v52_v12 = vsub.f32 %v45_v6, %v49_v10 }
  0x30   :  { %v53_v13 = vsub.f32 %v47_v8, %v51_v11 }
  0x31   :  { %v54_v14 = vand.u32 2147483647, %v52_v12 }
  0x32   :  { %v55_v15 = vand.u32 2147483647, %v53_v13 }
  0x33   :  { %v57_v16 = vsel %vm56_vm0, %v54_v14, 0.0 }
  0x34   :  { %v58_v17 = vsel %vm56_vm0, %v55_v15, 0.0 }
  0x35   :  { %v59_v18 = vadd.f32 %v58_v17, %v57_v16 }
  0x37   :  { %60 = vst.msk [vmem:[#allocation7] sm:$0xff] %vm56_vm0, %v59_v18 }
  0x38   :  { %141 = shalt.err (!%p138_p0)
}
  0x39   :  { %70 = dma.vmem_to_hbm [thread:$0]  %s68_s1, 128, %s187_s2, [#allocation4]  }
  0x3a   :  { %154 = dma.done.wait [#allocation4], 128  }
  0x3b   :  { %155 = vsyncadd [#allocation4], 4294967168 }
  0x3c   :  { %74 = vsyncpa [#allocation3], 1 }
  0x3d   :  { %75 = vsyncpa [#allocation6], 1 }
  0x3e   :  { %76 = vsyncpa [#allocation4], 1 }

</bundles_post_ra>
